<compile_context>
chip_gen: v7x
topology: tpu7x:2x2x1
jax: 0.10.0
libtpu: 0.0.40
codegen_flags: <defaults>
</compile_context>

<pallas_src>
import jax
import jax.numpy as jnp
from jax.experimental import pallas as pl
from jax.experimental.pallas import tpu as pltpu


def _attn_dot_kernel(h_ref, enc_ref, out_ref):
    """One batch tile: energy -> softmax(seq) -> context.

    h_ref  : (TB, H)     decoder hidden states (native dtype)
    enc_ref: (TB, S, H)  encoder outputs       (native dtype)
    out_ref: (TB, H)     context vectors (lane-dense 2-D output)
    """
    h = h_ref[...]                                              # (TB, H)
    enc = enc_ref[...]                                          # (TB, S, H)

    # Scores on the MXU with f32 accumulation; enc stays in its native dtype
    # (no f32 copy of the streamed slab, no (TB, S, H) broadcast temp).
    energy = jnp.einsum("bqh,bsh->bqs", h[:, None, :], enc,
                        preferred_element_type=jnp.float32)     # (TB, 1, S)

    # Max-stabilized softmax numerator over the sequence axis (f32).
    m = jnp.max(energy, axis=-1, keepdims=True)                 # (TB, 1, 1)
    e = jnp.exp(energy - m)                                     # (TB, 1, S)
    denom = jnp.sum(e, axis=-1, keepdims=True)                  # (TB, 1, 1)

    # Unnormalized context on the MXU; weights (values in (0, 1]) cast back
    # to the input dtype so bf16 inputs stay on the fast MXU path, f32 acc.
    ctx = jnp.einsum("bqs,bsh->bqh", e.astype(enc.dtype), enc,
                     preferred_element_type=jnp.float32)        # (TB, 1, H)

    # Fold the softmax normalization into a per-row scale; exact reciprocal
    # keeps the tight numerical tolerance of the reference check.
    inv = pl.reciprocal(denom, approx=False)                    # (TB, 1, 1)
    out_ref[...] = (ctx * inv)[:, 0, :].astype(out_ref.dtype)


def _round_up(x, m):
    return ((x + m - 1) // m) * m


def _choose_batch_tile(B, S, H, enc_itemsize, out_itemsize,
                       budget_bytes=32 * 1024 * 1024):
    """Batch tile sizing with explicit accounting of blocks *and* temps.

    Budget covers the double-buffered input/output blocks in their native
    dtype plus the f32 in-kernel temporaries (energy/e and the f32 context),
    staying well under v7x's 64 MiB physical VMEM (headroom vs. the 48 MiB
    vmem_limit set below); v5e/v6e (128 MiB) have even more slack.
    """
    io_per_b = 2 * ((S * H + H) * enc_itemsize + H * out_itemsize)
    tmp_per_b = (2 * S + 2 * H) * 4
    tb = max(1, budget_bytes // (io_per_b + tmp_per_b))
    # Cap the tile so the grid has ~8+ steps: lets the "parallel" axis shard
    # across v7x's two TensorCores and overlaps DMA with compute.
    tb = min(tb, _round_up(pl.cdiv(B, 8), 8))
    if tb >= B:
        return B                        # single block equals full batch dim
    if B <= 8:
        return B
    return max(8, (tb // 8) * 8)        # sublane-aligned (TB, H) out blocks


def attn_forward(hidden, encoder_outputs):
    """Pallas equivalent of Attn(method='dot').forward.

    hidden: (1, B, H), encoder_outputs: (B, S, H) -> context: (B, H).
    """
    B, S, H = encoder_outputs.shape
    out_dtype = jnp.result_type(hidden.dtype, encoder_outputs.dtype)

    # Tiny (B, H) hidden slab cast to the encoder dtype; the large encoder
    # tensor is passed through untouched -- no wrapper-side pad or copy.
    h2d = hidden[0].astype(encoder_outputs.dtype)

    tb = _choose_batch_tile(
        B, S, H,
        jnp.dtype(encoder_outputs.dtype).itemsize,
        jnp.dtype(out_dtype).itemsize,
    )
    grid = (pl.cdiv(B, tb),)            # ragged last block handled by Pallas

    return pl.pallas_call(
        _attn_dot_kernel,
        out_shape=jax.ShapeDtypeStruct((B, H), out_dtype),
        grid_spec=pltpu.PrefetchScalarGridSpec(
            num_scalar_prefetch=0,
            grid=grid,
            in_specs=[
                pl.BlockSpec((tb, H), lambda b: (b, 0)),
                pl.BlockSpec((tb, S, H), lambda b: (b, 0, 0)),
            ],
            out_specs=pl.BlockSpec((tb, H), lambda b: (b, 0)),
        ),
        compiler_params=pltpu.CompilerParams(
            dimension_semantics=("parallel",),
            vmem_limit_bytes=48 * 1024 * 1024,
        ),
    )(h2d, encoder_outputs)


def _attn_forward_ref(hidden, encoder_outputs):
    """Pure-JAX reference mirroring the PyTorch module exactly."""
    h = hidden[0]                                            # (B, H)
    energy = jnp.einsum("bh,bsh->bs", h, encoder_outputs)    # (B, S)
    attn = jax.nn.softmax(energy, axis=1)                    # (B, S)
    return jnp.einsum("bs,bsh->bh", attn, encoder_outputs)   # (B, H)


if __name__ == "__main__":
    B, S, H = 2, 8, 32  # small shapes; H plays the role of hidden_size

    key = jax.random.PRNGKey(0)
    k1, k2 = jax.random.split(key)
    hidden = jax.random.normal(k1, (1, B, H), dtype=jnp.float32)
    encoder_outputs = jax.random.normal(k2, (B, S, H), dtype=jnp.float32)

    out = jax.block_until_ready(attn_forward(hidden, encoder_outputs))
    ref = _attn_forward_ref(hidden, encoder_outputs)

    assert out.shape == (B, H)
    assert jnp.allclose(out, ref, atol=1e-5, rtol=1e-5), "mismatch vs reference"

    print("KERNEL_OK")
</pallas_src>

<mosaic_0001>
module attributes {stable_mosaic.version = 11 : i64} {
  func.func @_attn_dot_kernel(%arg0: i32, %arg1: memref<2x32xf32, #tpu.memory_space<vmem>>, %arg2: memref<2x8x32xf32, #tpu.memory_space<vmem>>, %arg3: memref<2x32xf32, #tpu.memory_space<vmem>>) attributes {dimension_semantics = [#tpu.dimension_semantics<parallel>], iteration_bounds = array<i64: 1>, scalar_prefetch = 0 : i64, scratch_operands = 0 : i64, tpu.core_type = #tpu.core_type<tc>, window_params = [{transform_indices = @transform_0, window_bounds = array<i64: 2, 32>}, {transform_indices = @transform_1, window_bounds = array<i64: 2, 8, 32>}, {transform_indices = @transform_2, window_bounds = array<i64: 2, 32>}]} {
    %c0 = arith.constant 0 : index
    %c0_0 = arith.constant 0 : index
    %0 = vector.load %arg1[%c0, %c0_0] : memref<2x32xf32, #tpu.memory_space<vmem>>, vector<2x32xf32>
    %c0_1 = arith.constant 0 : index
    %c0_2 = arith.constant 0 : index
    %c0_3 = arith.constant 0 : index
    %1 = vector.load %arg2[%c0_1, %c0_2, %c0_3] : memref<2x8x32xf32, #tpu.memory_space<vmem>>, vector<2x8x32xf32>
    %2 = vector.shape_cast %0 : vector<2x32xf32> to vector<2x1x32xf32>
    "tpu.trace_start"() <{level = 10 : i32, message = "bqh,bsh->bqs"}> : () -> ()
    %cst = arith.constant dense<0.000000e+00> : vector<2x1x8xf32>
    %3 = tpu.matmul %2, %1, %cst {dimension_numbers = #tpu.dot_dimension_numbers<[2], [2], [1], [1], [0, 0, 0, 1, 1, 1], [0], [0]>} : vector<2x1x32xf32>, vector<2x8x32xf32>, vector<2x1x8xf32> -> vector<2x1x8xf32>
    "tpu.trace_stop"() : () -> ()
    %cst_4 = arith.constant dense<0xFF800000> : vector<2x1xf32>
    %4 = vector.multi_reduction <maximumf>, %3, %cst_4 [2] : vector<2x1x8xf32> to vector<2x1xf32>
    %5 = vector.shape_cast %4 : vector<2x1xf32> to vector<2x1x1xf32>
    %6 = vector.broadcast %5 : vector<2x1x1xf32> to vector<2x1x8xf32>
    %7 = arith.subf %3, %6 : vector<2x1x8xf32>
    %8 = math.exp %7 : vector<2x1x8xf32>
    %cst_5 = arith.constant dense<0.000000e+00> : vector<2x1xf32>
    %9 = vector.multi_reduction <add>, %8, %cst_5 [2] : vector<2x1x8xf32> to vector<2x1xf32>
    %10 = vector.shape_cast %9 : vector<2x1xf32> to vector<2x1x1xf32>
    "tpu.trace_start"() <{level = 10 : i32, message = "bqs,bsh->bqh"}> : () -> ()
    %cst_6 = arith.constant dense<0.000000e+00> : vector<2x1x32xf32>
    %11 = tpu.matmul %8, %1, %cst_6 {dimension_numbers = #tpu.dot_dimension_numbers<[2], [1], [1], [2], [0, 0, 0, 1, 1, 2], [0], [0]>} : vector<2x1x8xf32>, vector<2x8x32xf32>, vector<2x1x32xf32> -> vector<2x1x32xf32>
    "tpu.trace_stop"() : () -> ()
    %12 = tpu.reciprocal %10 : vector<2x1x1xf32> -> vector<2x1x1xf32>
    %13 = vector.broadcast %12 : vector<2x1x1xf32> to vector<2x1x32xf32>
    %14 = arith.mulf %11, %13 : vector<2x1x32xf32>
    %15 = vector.shape_cast %14 : vector<2x1x32xf32> to vector<2x32xf32>
    %c0_7 = arith.constant 0 : index
    %c0_8 = arith.constant 0 : index
    %16 = vector.load %arg3[%c0_7, %c0_8] : memref<2x32xf32, #tpu.memory_space<vmem>>, vector<2x32xf32>
    tpu.vector_store %arg3[%c0_7, %c0_8], %15 {strides = array<i32>} : memref<2x32xf32, #tpu.memory_space<vmem>>, vector<2x32xf32>,
    return
  }
  func.func @transform_0(%arg0: i32) -> (i32, i32) {
    %c0_i32 = arith.constant 0 : i32
    %c0_i32_0 = arith.constant 0 : i32
    return %arg0, %c0_i32 : i32, i32
  }
  func.func @transform_1(%arg0: i32) -> (i32, i32, i32) {
    %c0_i32 = arith.constant 0 : i32
    %c0_i32_0 = arith.constant 0 : i32
    %c0_i32_1 = arith.constant 0 : i32
    return %arg0, %c0_i32, %c0_i32_0 : i32, i32, i32
  }
  func.func @transform_2(%arg0: i32) -> (i32, i32) {
    %c0_i32 = arith.constant 0 : i32
    %c0_i32_0 = arith.constant 0 : i32
    return %arg0, %c0_i32 : i32, i32
  }
}

</mosaic_0001>

<bundles_post_ra>
// kernel: tpu_custom_call.1
= control target key start
LH: loop header
LB: loop body
LE: loop exit
PB: predicated region body
PF: predicated region fallthrough
CT: control target
= control target key end

     0   :  { %7 = vsyncpa [#allocation3], 0  ;;  %s606_s0 = inlined_call_operand.hbm [shape: f32[2,32], index: 0, kind: input, shape index: {}]   ;;  %s607_s1 = inlined_call_operand.hbm [shape: f32[2,8,32], index: 1, kind: input, shape index: {}]   ;;  %s608_s2 = inlined_call_operand.hbm [shape: f32[2,32], index: 2, kind: output, shape index: {}]  }
   0x1   :  { %8 = vsyncpa [#allocation6], 0 }
   0x2   :  { %9 = vsyncpa [#allocation4], 0  ;;  %s532_s9 = smov [#allocation2]   ;;  %s533_s11 = smov [#allocation5]  }
   0x3   :  { %s16_s10 = sshll.u32 %s532_s9, 4  ;;  %s25_s12 = sshll.u32 %s533_s11, 4  ;;  %s17_s10 = int_to_ptr.vmem [resolvable:$true] %s16_s10  ;;  %s555_s12 = int_to_ptr.vmem [resolvable:$true] %s25_s12 }
   0x4   :  { %s460_s15 = scalar_lea.hbm %s606_s0, 32 }
   0x5   :  { %p461_p0 = scmp.ne.s32.totalorder %s606_s0, %s460_s15  ;;  %p464_p1 = scmp.lt.u32.totalorder %s460_s15, %s606_s0 }
   0x7   :  { %p466_p2 = pnand %p464_p1, %p461_p0 }
   0x9   :  { %469 = shalt.err (!%p466_p2)
}
   0xa   :  { %s470_s20 = scalar_lea.vmem %s17_s10, 32  ;;  %p475_p4 = scmp.lt.s32.totalorder %s17_s10, %s17_s10 }
   0xb   :  { %p471_p3 = scmp.ne.s32.totalorder %s17_s10, %s470_s20  ;;  %p476_p5 = scmp.lt.s32.totalorder %s470_s20, %s470_s20 }
   0xd   :  { %p477_p6 = por %p476_p5, %p475_p4 }
   0xf   :  { %p478_p7 = pnand %p477_p6, %p471_p3 }
  0x11   :  { %481 = shalt.err (!%p478_p7)
}
  0x12   :  { %19 = dma.hbm_to_vmem [thread:$0]  %s606_s0, 32, %s17_s10, [#allocation3]  }
  0x13   :  { %s482_s25 = scalar_lea.hbm %s607_s1, 256 }
  0x14   :  { %p483_p8 = scmp.ne.s32.totalorder %s607_s1, %s482_s25  ;;  %p486_p9 = scmp.lt.u32.totalorder %s482_s25, %s607_s1 }
  0x16   :  { %p488_p10 = pnand %p486_p9, %p483_p8 }
  0x18   :  { %491 = shalt.err (!%p488_p10)
}
  0x19   :  { %s492_s30 = scalar_lea.vmem %s555_s12, 256  ;;  %p497_p12 = scmp.lt.s32.totalorder %s555_s12, %s555_s12 }
  0x1a   :  { %p493_p11 = scmp.ne.s32.totalorder %s555_s12, %s492_s30  ;;  %p498_p13 = scmp.lt.s32.totalorder %s492_s30, %s492_s30 }
  0x1c   :  { %p499_p0 = por %p498_p13, %p497_p12 }
  0x1e   :  { %p500_p1 = pnand %p499_p0, %p493_p11 }
  0x20   :  { %503 = shalt.err (!%p500_p1)
}
  0x21   :  { %s534_s0 = smov 128   ;;  %s535_s3 = smov 8  }
  0x22   :  { %31 = dma.hbm_to_vmem [thread:$0]  %s607_s1, 256, %s555_s12, [#allocation6], %s534_s0, %s534_s0, %s535_s3  }
  0x23   :  { %526 = dma.done.wait [#allocation3], 32  }
  0x24   :  { %527 = vsyncadd [#allocation3], 4294967264 }
  0x25   :  { %528 = dma.done.wait [#allocation6], 256  }
  0x26   :  { %529 = vsyncadd [#allocation6], 4294967040  ;;  %v53_v0 = vlaneseq  ;;  %v536_v1 = vmov 0.0   ;;  %vm537_vm0 = vmmov 0   ;;  %v538_v2 = vmov 1966171168  }
  0x27   :  { %429 = vmatprep.subr.mxu1 %v536_v1  ;;  %424 = vmatprep.subr.mxu0 %v536_v1  ;;  %v51_v3 = vunpack.c.l.s4 %v538_v2  ;;  %vm64_vm1 = vcmask 261120   ;;  %v40_v7 = vld [vmem:[#allocation5 + $0x8] sm:$0xff]  ;;  %v39_v8 = vld [vmem:[#allocation5] sm:$0xff]  ;;  %vm215_vm2 = vcmask 57344   ;;  %vm234_vm3 = vcmask 64512   ;;  %s539_s1 = smov [#allocation7]  }
  0x28   :  { %431 = vmatprep.mubr.msk.f32.mxu1 %vm537_vm0, %v536_v1  ;;  %v54_v4 = vshrl.u32 %v53_v0, 7  ;;  %426 = vmatprep.mubr.msk.f32.mxu0 %vm537_vm0, %v536_v1  ;;  %v409_v9 = vld.sshfl [vmem:[#allocation2] sm:$0x11 pattern:$0x75316420]  ;;  %s399_s6 = sshll.u32 %s539_s1, 4  ;;  %s400_s6 = int_to_ptr.vmem [resolvable:$true] %s399_s6 }
  0x29   :  { %v52_v5 = vunpack.c.0.s8 %v51_v3  ;;  %430 = vmatpush3.xpose.msk.msra.mxu1 %vm64_vm1, %v40_v7  ;;  %425 = vmatpush3.xpose.msk.msra.mxu0 %vm64_vm1, %v39_v8  ;;  %v49_v10 = vcombine.high %v409_v9, %v409_v9  ;;  %vm388_vm4 = vcmask 1041409   ;;  %vm391_vm5 = vcmask 254976   ;;  %s504_s7 = scalar_lea.vmem %s400_s6, 32  ;;  %p509_p3 = scmp.lt.s32.totalorder %s400_s6, %s400_s6 }
  0x2a   :  { %439 = vmatprep.subr.mxu1 %v536_v1  ;;  %434 = vmatprep.subr.mxu0 %v536_v1  ;;  %p505_p2 = scmp.ne.s32.totalorder %s400_s6, %s504_s7  ;;  %p510_p4 = scmp.lt.s32.totalorder %s504_s7, %s504_s7 }
  0x2b   :  { %v55_v6 = vsub.s32 %v52_v5, %v54_v4 }
  0x2c   :  { %p511_p5 = por %p510_p4, %p509_p3 }
  0x2d   :  { %v56_v11 = vrot.slane %v409_v9, %v55_v6  ;;  %v63_v12 = vrot.slane %v49_v10, %v55_v6 }
  0x2e   :  { %p512_p6 = pnand %p511_p5, %p505_p2 }
  0x2f   :  { %427 = vmatmul.mubr.msk.f32.vlgmr.msra.gmra.mrb[0].mxu0 %vm64_vm1, %v56_v11  ;;  %432 = vmatmul.mubr.msk.f32.vlgmr.msra.gmra.mrb[0].mxu1 %vm64_vm1, %v63_v12 }
  0x30   :  { %435 = vmatpush3.msra.mxu0 %v39_v8  ;;  %440 = vmatpush3.msra.mxu1 %v40_v7 }
  0x31   :  { %441 = vmatprep.mubr.msk.f32.mxu1 %vm537_vm0, %v536_v1  ;;  %436 = vmatprep.mubr.msk.f32.mxu0 %vm537_vm0, %v536_v1 }
 0x102   :  { %v136_v13 = vpop.f32.mrb[0].mxu0  ;;  %v211_v14 = vpop.f32.mrb[0].mxu1 }
 0x103   :  { %v428_v15 = vpop.f32.mrb[1].mxu0  ;;  %v433_v16 = vpop.f32.mrb[1].mxu1  ;;  %v219_v17 = vsel %vm215_vm2, %v211_v14, -inf  ;;  %v216_v18 = vsel %vm215_vm2, %v136_v13, -inf }
 0x104   :  { %220 = vmax.xlane.f32.xlu0 %v219_v17 }
 0x108   :  { %217 = vmax.xlane.f32.xlu0 %v216_v18 }
 0x191   :  { %v221_v19 = vpop.xlane.xlu0 %220 }
 0x192   :  { %v223_v20 = vsub.f32 %v211_v14, %v221_v19 }
 0x194   :  { %v226_v21 = vmul.f32 1.442695, %v223_v20 }
 0x195   :  { %v218_v22 = vpop.xlane.xlu0 %217 }
 0x196   :  { %452 = vpow2.f32 %v226_v21  ;;  %v222_v23 = vsub.f32 %v136_v13, %v218_v22 }
 0x198   :  { %v224_v24 = vmul.f32 1.442695, %v222_v23 }
 0x19a   :  { %454 = vpow2.f32 %v224_v24 }
 0x1a0   :  { %v453_v25 = vpop.eup %452 }
 0x1a1   :  { %442 = vmatmul.mubr.msk.f32.vlgmr.msra.gmra.mrb[2].mxu1 %vm234_vm3, %v453_v25  ;;  %v231_v26 = vsel %vm215_vm2, %v453_v25, 0.0 }
 0x1a2   :  { %232 = vadd.xlane.f32.xlu1 %v231_v26 }
 0x1a4   :  { %v455_v27 = vpop.eup %454 }
 0x1a5   :  { %437 = vmatmul.mubr.msk.f32.vlgmr.msra.gmra.mrb[2].mxu0 %vm234_vm3, %v455_v27  ;;  %v228_v28 = vsel %vm215_vm2, %v455_v27, 0.0 }
 0x1a6   :  { %229 = vadd.xlane.f32.xlu1 %v228_v28 }
 0x22f   :  { %v233_v29 = vpop.xlane.xlu1 %232 }
 0x230   :  { %456 = vrcp.f32 %v233_v29 }
 0x233   :  { %v230_v30 = vpop.xlane.xlu1 %229 }
 0x234   :  { %458 = vrcp.f32 %v230_v30 }
 0x23a   :  { %v457_v31 = vpop.eup %456 }
 0x23e   :  { %v459_v35 = vpop.eup %458 }
 0x274   :  { %v377_v32 = vpop.f32.mrb[2].mxu1 }
 0x275   :  { %v384_v33 = vmul.f32 %v457_v31, %v377_v32  ;;  %v443_v34 = vpop.f32.mrb[3].mxu1 }
 0x277   :  { %v387_v37 = vrot.slane %v384_v33, 7 }
 0x278   :  { %v304_v36 = vpop.f32.mrb[2].mxu0 }
 0x279   :  { %v383_v38 = vmul.f32 %v459_v35, %v304_v36  ;;  %v438_v39 = vpop.f32.mrb[3].mxu0 }
 0x27b   :  { %v389_v40 = vsel %vm388_vm4, %v387_v37, %v383_v38 }
 0x27c   :  { %392 = vst.msk [vmem:[#allocation7] sm:$0x3] %vm391_vm5, %v389_v40 }
 0x27d   :  { %515 = shalt.err (!%p512_p6)
}
 0x27e   :  { %s516_s10 = scalar_lea.hbm %s608_s2, 32 }
 0x27f   :  { %p517_p7 = scmp.ne.s32.totalorder %s608_s2, %s516_s10  ;;  %p520_p8 = scmp.lt.u32.totalorder %s516_s10, %s608_s2 }
 0x281   :  { %p522_p9 = pnand %p520_p8, %p517_p7 }
 0x283   :  { %525 = shalt.err (!%p522_p9)
}
 0x284   :  { %402 = dma.vmem_to_hbm [thread:$0]  %s400_s6, 32, %s608_s2, [#allocation4]  }
 0x285   :  { %530 = dma.done.wait [#allocation4], 32  }
 0x286   :  { %531 = vsyncadd [#allocation4], 4294967264 }
 0x287   :  { %406 = vsyncpa [#allocation3], 1 }
 0x288   :  { %407 = vsyncpa [#allocation6], 1 }
 0x289   :  { %408 = vsyncpa [#allocation4], 1 }

</bundles_post_ra>
